<compile_context>
chip_gen: v7x
topology: tpu7x:2x2x1
jax: 0.10.0
libtpu: 0.0.40
codegen_flags: <defaults>
</compile_context>

<pallas_src>
import jax
import jax.numpy as jnp
from jax.experimental import pallas as pl
from jax.experimental.pallas import tpu as pltpu


def mlp_kernel(x_ref, w1b_ref, w2b_ref, o_ref):
    # x_ref:   (batch, 2)              f32
    # w1b_ref: (3, n_hidden)           rows 0..1 = W1, row 2 = b1
    # w2b_ref: (n_hidden+1, n_output)  rows 0..n_hidden-1 = W2, last row = b2
    n_hidden = w1b_ref.shape[1]
    x = x_ref[...]

    # --- Layer 1 on the VPU (K=2 outer-product accumulation, bias folded in).
    # h = b1 + x[:,0] (.) W1[0,:] + x[:,1] (.) W1[1,:]
    h = (w1b_ref[2:3, :]
         + x[:, 0:1] * w1b_ref[0:1, :]
         + x[:, 1:2] * w1b_ref[1:2, :])
    h = jnp.maximum(h, 0.0)  # ReLU (VPU)

    # --- Layer 2 on the MXU: (batch, n_hidden) @ (n_hidden, n_output) + b2.
    y = jnp.dot(h, w2b_ref[0:n_hidden, :], preferred_element_type=jnp.float32)
    o_ref[...] = y + w2b_ref[n_hidden:n_hidden + 1, :]


def prepare_params(w1, b1, w2, b2):
    """One-time packing of (W, b) pairs into single blocks (cuts DMA count)."""
    w1b = jnp.concatenate([w1, b1.reshape(1, -1)], axis=0)  # (n_feature+1, n_hidden)
    w2b = jnp.concatenate([w2, b2.reshape(1, -1)], axis=0)  # (n_hidden+1, n_output)
    return w1b, w2b


@jax.jit
def net_forward(x, w1b, w2b):
    """Pallas TPU forward pass of Net: Linear -> ReLU -> Linear.

    Grid-less single pallas_call; everything fits one VMEM tile. Packed
    weight+bias blocks are prepared once via prepare_params().
    """
    batch, n_feature = x.shape
    assert n_feature == 2, "mlp_kernel's VPU layer-1 path is specialized to n_feature == 2"
    n_hidden = w1b.shape[1]
    n_output = w2b.shape[1]
    assert w1b.shape[0] == n_feature + 1 and w2b.shape[0] == n_hidden + 1

    flops = (2 * batch * n_feature * n_hidden      # layer 1 MACs
             + batch * n_hidden                    # ReLU
             + 2 * batch * n_hidden * n_output)    # layer 2 MACs
    bytes_accessed = 4 * (x.size + w1b.size + w2b.size + batch * n_output)

    vmem = pl.BlockSpec(memory_space=pltpu.VMEM)
    return pl.pallas_call(
        mlp_kernel,
        out_shape=jax.ShapeDtypeStruct((batch, n_output), jnp.float32),
        in_specs=[vmem, vmem, vmem],
        out_specs=vmem,
        cost_estimate=pl.CostEstimate(
            flops=flops, transcendentals=0, bytes_accessed=bytes_accessed),
    )(x, w1b, w2b)


def init_params(key, n_feature, n_hidden, n_output):
    """Deterministic parameter init mimicking torch.nn.Linear's uniform init."""
    k1, k2, k3, k4 = jax.random.split(key, 4)
    bound1 = 1.0 / jnp.sqrt(n_feature)
    bound2 = 1.0 / jnp.sqrt(n_hidden)
    w1 = jax.random.uniform(k1, (n_feature, n_hidden), jnp.float32, -bound1, bound1)
    b1 = jax.random.uniform(k2, (1, n_hidden), jnp.float32, -bound1, bound1)
    w2 = jax.random.uniform(k3, (n_hidden, n_output), jnp.float32, -bound2, bound2)
    b2 = jax.random.uniform(k4, (1, n_output), jnp.float32, -bound2, bound2)
    return w1, b1, w2, b2


if __name__ == "__main__":
    key = jax.random.PRNGKey(0)
    k_data0, k_data1, k_params = jax.random.split(key, 3)

    # Mirror the reference script's data construction:
    # x0 ~ N(+2, 1), x1 ~ N(-2, 1), concatenated along batch -> (200, 2)
    n_per_class, n_feature, n_hidden, n_output = 100, 2, 32, 2
    x0 = 2.0 + jax.random.normal(k_data0, (n_per_class, n_feature), jnp.float32)
    x1 = -2.0 + jax.random.normal(k_data1, (n_per_class, n_feature), jnp.float32)
    x = jnp.concatenate([x0, x1], axis=0)  # (200, 2) float32

    w1, b1, w2, b2 = init_params(k_params, n_feature, n_hidden, n_output)

    # Pack (W, b) pairs once, outside the (jitted) forward.
    w1b, w2b = prepare_params(w1, b1, w2, b2)
    w1b, w2b = jax.block_until_ready((w1b, w2b))

    out = net_forward(x, w1b, w2b)
    out = jax.block_until_ready(out)

    # Sanity check against plain-JAX reference of the same math.
    ref = jnp.maximum(x @ w1 + b1, 0.0) @ w2 + b2
    assert out.shape == (2 * n_per_class, n_output)
    assert jnp.allclose(out, ref, atol=1e-5, rtol=1e-5)

    print("KERNEL_OK")
</pallas_src>

<mosaic_0001>
module attributes {stable_mosaic.version = 11 : i64} {
  func.func @mlp_kernel(%arg0: memref<200x2xf32, #tpu.memory_space<vmem>>, %arg1: memref<3x32xf32, #tpu.memory_space<vmem>>, %arg2: memref<33x2xf32, #tpu.memory_space<vmem>>, %arg3: memref<200x2xf32, #tpu.memory_space<vmem>>) attributes {dimension_semantics = [], scalar_prefetch = 0 : i64, scratch_operands = 0 : i64, tpu.core_type = #tpu.core_type<tc>} {
    %c0 = arith.constant 0 : index
    %c0_0 = arith.constant 0 : index
    %0 = vector.load %arg0[%c0, %c0_0] : memref<200x2xf32, #tpu.memory_space<vmem>>, vector<200x2xf32>
    %c2 = arith.constant 2 : index
    %c0_1 = arith.constant 0 : index
    %1 = vector.load %arg1[%c2, %c0_1] : memref<3x32xf32, #tpu.memory_space<vmem>>, vector<1x32xf32>
    %2 = vector.extract_strided_slice %0 {offsets = [0, 0], sizes = [200, 1], strides = [1, 1]} : vector<200x2xf32> to vector<200x1xf32>
    %c0_2 = arith.constant 0 : index
    %c0_3 = arith.constant 0 : index
    %3 = vector.load %arg1[%c0_2, %c0_3] : memref<3x32xf32, #tpu.memory_space<vmem>>, vector<1x32xf32>
    %4 = vector.broadcast %2 : vector<200x1xf32> to vector<200x32xf32>
    %5 = vector.broadcast %3 : vector<1x32xf32> to vector<200x32xf32>
    %6 = arith.mulf %4, %5 : vector<200x32xf32>
    %7 = vector.broadcast %1 : vector<1x32xf32> to vector<200x32xf32>
    %8 = arith.addf %7, %6 : vector<200x32xf32>
    %9 = vector.extract_strided_slice %0 {offsets = [0, 1], sizes = [200, 1], strides = [1, 1]} : vector<200x2xf32> to vector<200x1xf32>
    %c1 = arith.constant 1 : index
    %c0_4 = arith.constant 0 : index
    %10 = vector.load %arg1[%c1, %c0_4] : memref<3x32xf32, #tpu.memory_space<vmem>>, vector<1x32xf32>
    %11 = vector.broadcast %9 : vector<200x1xf32> to vector<200x32xf32>
    %12 = vector.broadcast %10 : vector<1x32xf32> to vector<200x32xf32>
    %13 = arith.mulf %11, %12 : vector<200x32xf32>
    %14 = arith.addf %8, %13 : vector<200x32xf32>
    %cst = arith.constant 0.000000e+00 : f32
    %15 = vector.broadcast %cst : f32 to vector<200x32xf32>
    %16 = arith.maximumf %14, %15 : vector<200x32xf32>
    %c0_5 = arith.constant 0 : index
    %c0_6 = arith.constant 0 : index
    %17 = vector.load %arg2[%c0_5, %c0_6] : memref<33x2xf32, #tpu.memory_space<vmem>>, vector<32x2xf32>
    %cst_7 = arith.constant dense<0.000000e+00> : vector<200x2xf32>
    %18 = tpu.matmul %16, %17, %cst_7 {dimension_numbers = #tpu.dot_dimension_numbers<[1], [0], [0], [1], [0, 0, 1, 1], [], []>} : vector<200x32xf32>, vector<32x2xf32>, vector<200x2xf32> -> vector<200x2xf32>
    %c32 = arith.constant 32 : index
    %c0_8 = arith.constant 0 : index
    %19 = vector.load %arg2[%c32, %c0_8] : memref<33x2xf32, #tpu.memory_space<vmem>>, vector<1x2xf32>
    %20 = vector.broadcast %19 : vector<1x2xf32> to vector<200x2xf32>
    %21 = arith.addf %18, %20 : vector<200x2xf32>
    %c0_9 = arith.constant 0 : index
    %c0_10 = arith.constant 0 : index
    %22 = vector.load %arg3[%c0_9, %c0_10] : memref<200x2xf32, #tpu.memory_space<vmem>>, vector<200x2xf32>
    tpu.vector_store %arg3[%c0_9, %c0_10], %21 {strides = array<i32>} : memref<200x2xf32, #tpu.memory_space<vmem>>, vector<200x2xf32>,
    return
  }
}

</mosaic_0001>

<bundles_post_ra>
// kernel: net_forward.1
= control target key start
LH: loop header
LB: loop body
LE: loop exit
PB: predicated region body
PF: predicated region fallthrough
CT: control target
= control target key end

     0   :  { %v893_v0 = vmov 0   ;;  %v894_v4 = vmov 0.0|0.0   ;;  %v895_v5 = vmov 1   ;;  %vm896_vm0 = vmmov 0   ;;  %s1341_s0 = inlined_call_operand.vmem [shape: f32[200,2], index: 0, kind: input, shape index: {}]   ;;  %s1342_s2 = inlined_call_operand.vmem [shape: f32[33,2], index: 2, kind: input, shape index: {}]   ;;  %s1343_s1 = inlined_call_operand.vmem [shape: f32[3,32], index: 1, kind: input, shape index: {}]   ;;  %s1344_s3 = inlined_call_operand.vmem [shape: f32[200,2], index: 3, kind: output, shape index: {}]  }
   0x1   :  { %867 = vset.pattern.permute.xlu1 %v893_v0  ;;  %865 = vset.pattern.permute.xlu0 %v893_v0  ;;  %v15_v1 = vld [vmem:[%s1341_s0 + $0x8] sm:$0xff]  ;;  %v14_v2 = vld [vmem:[%s1341_s0] sm:$0xff]  ;;  %v406_v9 = vld [vmem:[%s1342_s2 + $0x10] sm:$0xff]  ;;  %v897_v12 = vmov 0.0   ;;  %vm413_vm1 = vcmask 261120   ;;  %vm679_vm2 = vcmask 15360  }
   0x2   :  { %48 = vperm.xlu1 %867, %v15_v1   ;;  %43 = vperm.xlu0 %865, %v14_v2   ;;  %v27_v3 = vld [vmem:[%s1341_s0 + $0x68] sm:$0xff]  ;;  %v404_v6 = vld [vmem:[%s1342_s2] sm:$0xff]  ;;  %v407_v10 = vld [vmem:[%s1342_s2 + $0x18] sm:$0xff] }
   0x3   :  { %850 = vmatprep.subr.bf16.mxu0 %v894_v4  ;;  %856 = vmatprep.subr.bf16.mxu1 %v894_v4  ;;  %v405_v7 = vld [vmem:[%s1342_s2 + $0x8] sm:$0xff]  ;;  %v17_v11 = vld [vmem:[%s1341_s0 + $0x18] sm:$0xff]  ;;  %v16_v13 = vld [vmem:[%s1341_s0 + $0x10] sm:$0xff]  ;;  %v854_v14 = vpack.c.bf16 %v407_v10, %v406_v9 }
   0x4   :  { %v851_v8 = vpack.c.bf16 %v405_v7, %v404_v6  ;;  %775 = vmatprep.mubr.msk.f32.mxu0 %vm896_vm0, %v897_v12  ;;  %814 = vmatprep.mubr.msk.f32.mxu1 %vm896_vm0, %v897_v12  ;;  %v19_v15 = vld [vmem:[%s1341_s0 + $0x28] sm:$0xff]  ;;  %v21_v16 = vld [vmem:[%s1341_s0 + $0x38] sm:$0xff]  ;;  %v28_v17 = vld [vmem:[%s1341_s0 + $0x70] sm:$0xff] }
   0x5   :  { %v23_v18 = vld [vmem:[%s1341_s0 + $0x48] sm:$0xff]  ;;  %v29_v19 = vld [vmem:[%s1341_s0 + $0x78] sm:$0xff]  ;;  %v18_v21 = vld [vmem:[%s1341_s0 + $0x20] sm:$0xff] }
   0x6   :  { %108 = vperm.xlu1 %867, %v27_v3   ;;  %866 = vset.pattern.permute.xlu0 %v895_v5  ;;  %v25_v20 = vld [vmem:[%s1341_s0 + $0x58] sm:$0xff]  ;;  %v30_v22 = vld [vmem:[%s1341_s0 + $0x80] sm:$0xff]  ;;  %v32_v23 = vld [vmem:[%s1341_s0 + $0x90] sm:$0xff] }
   0x7   :  { %226 = vperm.xlu0 %866, %v14_v2   ;;  %852 = vmatpush3.bf16.msra.mxu0 %v851_v8  ;;  %v31_v24 = vld [vmem:[%s1341_s0 + $0x88] sm:$0xff]  ;;  %v34_v25 = vld [vmem:[%s1341_s0 + $0xa0] sm:$0xff]  ;;  %v20_v26 = vld [vmem:[%s1341_s0 + $0x30] sm:$0xff] }
   0x8   :  { %858 = vmatpush3.bf16.msra.mxu1 %v851_v8  ;;  %853 = vmatprep.subr.bf16.mxu0 %v894_v4  ;;  %v36_v27 = vld [vmem:[%s1341_s0 + $0xb0] sm:$0xff]  ;;  %v1006_v28 = vld [vmem:[%s1341_s0 + $0xc0] sm:$0xff]  ;;  %v33_v29 = vld [vmem:[%s1341_s0 + $0x98] sm:$0xff] }
   0x9   :  { %857 = vmatprep.subr.bf16.mxu1 %v894_v4  ;;  %v22_v30 = vld [vmem:[%s1341_s0 + $0x40] sm:$0xff]  ;;  %v35_v31 = vld [vmem:[%s1341_s0 + $0xa8] sm:$0xff]  ;;  %v24_v32 = vld [vmem:[%s1341_s0 + $0x50] sm:$0xff] }
   0xa   :  { %868 = vset.pattern.permute.xlu1 %v895_v5  ;;  %v37_v33 = vld [vmem:[%s1341_s0 + $0xb8] sm:$0xff]  ;;  %v1037_v34 = vld [vmem:[%s1343_s1] ss:$0 sm:$0xff]  ;;  %v1044_v38 = vld [vmem:[%s1343_s1 + $0x2] ss:$0 sm:$0xff] }
   0xb   :  { %230 = vperm.xlu1 %868, %v15_v1   ;;  %278 = vperm.xlu0 %866, %v27_v3   ;;  %v1049_v39 = vld [vmem:[%s1343_s1 + $0x1] ss:$0 sm:$0xff] }
   0xc   :  { %855 = vmatpush3.bf16.msra.mxu0 %v854_v14  ;;  %859 = vmatpush3.bf16.msra.mxu1 %v854_v14  ;;  %v26_v42 = vld [vmem:[%s1341_s0 + $0x60] sm:$0xff] }
   0xf   :  { %869 = vset.pattern.permute.xlu1 %v893_v0  ;;  %238 = vperm.xlu0 %866, %v17_v11  }
  0x10   :  { %53 = vperm.xlu1 %869, %v16_v13  }
  0x13   :  { %246 = vperm.xlu0 %866, %v19_v15  }
  0x14   :  { %870 = vset.pattern.permute.xlu1 %v895_v5 }
  0x15   :  { %234 = vperm.xlu1 %870, %v16_v13  }
  0x17   :  { %254 = vperm.xlu0 %866, %v21_v16  }
  0x19   :  { %282 = vperm.xlu1 %870, %v28_v17  }
  0x1b   :  { %262 = vperm.xlu0 %866, %v23_v18  }
  0x1d   :  { %871 = vset.pattern.permute.xlu1 %v893_v0 }
  0x1e   :  { %118 = vperm.xlu1 %871, %v29_v19  }
  0x1f   :  { %270 = vperm.xlu0 %866, %v25_v20  }
  0x22   :  { %872 = vset.pattern.permute.xlu1 %v895_v5 }
  0x23   :  { %286 = vperm.xlu1 %872, %v29_v19   ;;  %888 = vset.pattern.permute.xlu0 %v893_v0 }
  0x24   :  { %113 = vperm.xlu0 %888, %v28_v17  }
  0x27   :  { %873 = vset.pattern.permute.xlu1 %v893_v0 }
  0x28   :  { %63 = vperm.xlu1 %873, %v18_v21   ;;  %58 = vperm.xlu0 %888, %v17_v11  }
  0x2c   :  { %874 = vset.pattern.permute.xlu1 %v895_v5  ;;  %123 = vperm.xlu0 %888, %v30_v22  }
  0x2d   :  { %242 = vperm.xlu1 %874, %v18_v21  }
  0x30   :  { %68 = vperm.xlu0 %888, %v19_v15  }
  0x31   :  { %290 = vperm.xlu1 %874, %v30_v22  }
  0x34   :  { %133 = vperm.xlu0 %888, %v32_v23  }
  0x35   :  { %875 = vset.pattern.permute.xlu1 %v893_v0 }
  0x36   :  { %128 = vperm.xlu1 %875, %v31_v24  }
  0x38   :  { %78 = vperm.xlu0 %888, %v21_v16  }
  0x3a   :  { %876 = vset.pattern.permute.xlu1 %v895_v5 }
  0x3b   :  { %294 = vperm.xlu1 %876, %v31_v24  }
  0x3c   :  { %143 = vperm.xlu0 %888, %v34_v25  }
  0x3f   :  { %877 = vset.pattern.permute.xlu1 %v893_v0 }
  0x40   :  { %73 = vperm.xlu1 %877, %v20_v26   ;;  %88 = vperm.xlu0 %888, %v23_v18  }
  0x44   :  { %878 = vset.pattern.permute.xlu1 %v895_v5  ;;  %153 = vperm.xlu0 %888, %v36_v27  }
  0x45   :  { %250 = vperm.xlu1 %878, %v20_v26  }
  0x48   :  { %98 = vperm.xlu0 %888, %v25_v20  }
  0x49   :  { %298 = vperm.xlu1 %878, %v32_v23  }
  0x4c   :  { %163 = vperm.xlu0 %888, %v1006_v28  }
  0x4d   :  { %879 = vset.pattern.permute.xlu1 %v893_v0 }
  0x4e   :  { %138 = vperm.xlu1 %879, %v33_v29  }
  0x50   :  { %892 = vset.pattern.permute.xlu0 %v895_v5 }
  0x52   :  { %880 = vset.pattern.permute.xlu1 %v895_v5 }
  0x53   :  { %302 = vperm.xlu1 %880, %v33_v29  }
  0x57   :  { %881 = vset.pattern.permute.xlu1 %v893_v0 }
  0x58   :  { %83 = vperm.xlu1 %881, %v22_v30  }
  0x5c   :  { %882 = vset.pattern.permute.xlu1 %v895_v5 }
  0x5d   :  { %258 = vperm.xlu1 %882, %v22_v30  }
  0x61   :  { %306 = vperm.xlu1 %882, %v34_v25  }
  0x65   :  { %883 = vset.pattern.permute.xlu1 %v893_v0 }
  0x66   :  { %148 = vperm.xlu1 %883, %v35_v31  }
  0x6a   :  { %884 = vset.pattern.permute.xlu1 %v895_v5 }
  0x6b   :  { %310 = vperm.xlu1 %884, %v35_v31  }
  0x6f   :  { %885 = vset.pattern.permute.xlu1 %v893_v0 }
  0x70   :  { %93 = vperm.xlu1 %885, %v24_v32  }
  0x74   :  { %886 = vset.pattern.permute.xlu1 %v895_v5 }
  0x75   :  { %266 = vperm.xlu1 %886, %v24_v32  }
  0x79   :  { %314 = vperm.xlu1 %886, %v36_v27  }
  0x7d   :  { %887 = vset.pattern.permute.xlu1 %v893_v0 }
  0x7e   :  { %158 = vperm.xlu1 %887, %v37_v33  }
  0x81   :  { %v49_v35 = vpop.permute.xlu1 %48  ;;  %v44_v36 = vpop.permute.xlu0 %43 }
  0x82   :  { %889 = vset.pattern.permute.xlu1 %v895_v5  ;;  %v170_v37 = vmul.f32 %v1037_v34, %v44_v36  ;;  %v171_v43 = vmul.f32 %v1037_v34, %v49_v35 }
  0x83   :  { %318 = vperm.xlu1 %889, %v37_v33  }
  0x84   :  { %v199_v40 = vadd.f32 %v1044_v38, %v170_v37  ;;  %v200_v48 = vadd.f32 %v1044_v38, %v171_v43 }
  0x85   :  { %v109_v41 = vpop.permute.xlu1 %108 }
  0x86   :  { %v227_v44 = vpop.permute.xlu0 %226  ;;  %v183_v45 = vmul.f32 %v1037_v34, %v109_v41 }
  0x87   :  { %v329_v46 = vmul.f32 %v1049_v39, %v227_v44  ;;  %890 = vset.pattern.permute.xlu1 %v893_v0 }
  0x88   :  { %103 = vperm.xlu1 %890, %v26_v42   ;;  %v212_v51 = vadd.f32 %v1044_v38, %v183_v45 }
  0x89   :  { %v354_v47 = vadd.f32 %v329_v46, %v199_v40 }
  0x8a   :  { %v231_v49 = vpop.permute.xlu1 %230  ;;  %v279_v50 = vpop.permute.xlu0 %278 }
  0x8b   :  { %v379_v52 = vmax.f32 %v354_v47, 0.0  ;;  %v330_v53 = vmul.f32 %v1049_v39, %v231_v49  ;;  %v342_v54 = vmul.f32 %v1049_v39, %v279_v50 }
  0x8c   :  { %891 = vset.pattern.permute.xlu1 %v895_v5 }
  0x8d   :  { %v355_v55 = vadd.f32 %v330_v53, %v200_v48  ;;  %v367_v56 = vadd.f32 %v342_v54, %v212_v51  ;;  %274 = vperm.xlu1 %891, %v26_v42   ;;  %776 = vmatmul.mubr.msk.f32.vlgmr.msra.gmra.mrb[0].mxu0 %vm413_vm1, %v379_v52 }
  0x8e   :  { %v239_v57 = vpop.permute.xlu0 %238  ;;  %778 = vmatprep.mubr.msk.f32.mxu0 %vm896_vm0, %v897_v12 }
  0x8f   :  { %v380_v58 = vmax.f32 %v355_v55, 0.0  ;;  %v392_v59 = vmax.f32 %v367_v56, 0.0  ;;  %v54_v60 = vpop.permute.xlu1 %53  ;;  %v332_v19 = vmul.f32 %v1049_v39, %v239_v57 }
  0x90   :  { %v172_v61 = vmul.f32 %v1037_v34, %v54_v60 }
  0x91   :  { %322 = vperm.xlu1 %891, %v1006_v28   ;;  %779 = vmatmul.mubr.msk.f32.gmra.mrb[2].mxu0 %vm413_vm1, %v380_v58 }
  0x92   :  { %815 = vmatmul.mubr.msk.f32.vlgmr.msra.gmra.mrb[0].mxu1 %vm413_vm1, %v392_v59  ;;  %v247_v62 = vpop.permute.xlu0 %246  ;;  %781 = vmatprep.mubr.msk.f32.mxu0 %vm896_vm0, %v897_v12  ;;  %v201_v0 = vadd.f32 %v1044_v38, %v172_v61 }
  0x93   :  { %817 = vmatprep.mubr.msk.f32.mxu1 %vm896_vm0, %v897_v12  ;;  %v334_v41 = vmul.f32 %v1049_v39, %v247_v62 }
  0x94   :  { %v235_v63 = vpop.permute.xlu1 %234 }
  0x95   :  { %v331_v1 = vmul.f32 %v1049_v39, %v235_v63 }
  0x96   :  { %v1077_v2 = vpop.permute.xlu0 %254 }
  0x97   :  { %v356_v3 = vadd.f32 %v331_v1, %v201_v0  ;;  %v336_v63 = vmul.f32 %v1049_v39, %v1077_v2 }
  0x98   :  { %v283_v4 = vpop.permute.xlu1 %282 }
  0x99   :  { %v381_v5 = vmax.f32 %v356_v3, 0.0  ;;  %v343_v14 = vmul.f32 %v1049_v39, %v283_v4 }
  0x9a   :  { %v1079_v6 = vpop.permute.xlu0 %262 }
  0x9b   :  { %782 = vmatmul.mubr.msk.f32.gmra.mrb[4].mxu0 %vm413_vm1, %v381_v5 }
  0x9c   :  { %784 = vmatprep.mubr.msk.f32.mxu0 %vm896_vm0, %v897_v12 }
  0x9d   :  { %v119_v7 = vpop.permute.xlu1 %118 }
  0x9e   :  { %v1084_v8 = vpop.permute.xlu0 %270  ;;  %v185_v11 = vmul.f32 %v1037_v34, %v119_v7 }
  0xa0   :  { %v214_v20 = vadd.f32 %v1044_v38, %v185_v11 }
  0xa2   :  { %v287_v9 = vpop.permute.xlu1 %286 }
  0xa3   :  { %v114_v10 = vpop.permute.xlu0 %113  ;;  %v344_v15 = vmul.f32 %v1049_v39, %v287_v9 }
  0xa4   :  { %v184_v13 = vmul.f32 %v1037_v34, %v114_v10 }
  0xa5   :  { %v369_v24 = vadd.f32 %v344_v15, %v214_v20 }
  0xa6   :  { %v213_v16 = vadd.f32 %v1044_v38, %v184_v13 }
  0xa7   :  { %v64_v17 = vpop.permute.xlu1 %63  ;;  %v59_v18 = vpop.permute.xlu0 %58  ;;  %v394_v33 = vmax.f32 %v369_v24, 0.0 }
  0xa8   :  { %v368_v21 = vadd.f32 %v343_v14, %v213_v16  ;;  %v173_v22 = vmul.f32 %v1037_v34, %v59_v18  ;;  %v174_v23 = vmul.f32 %v1037_v34, %v64_v17 }
  0xaa   :  { %v393_v25 = vmax.f32 %v368_v21, 0.0  ;;  %v202_v26 = vadd.f32 %v1044_v38, %v173_v22  ;;  %v203_v31 = vadd.f32 %v1044_v38, %v174_v23 }
  0xab   :  { %v124_v27 = vpop.permute.xlu0 %123 }
  0xac   :  { %v357_v28 = vadd.f32 %v332_v19, %v202_v26  ;;  %v186_v29 = vmul.f32 %v1037_v34, %v124_v27  ;;  %v243_v30 = vpop.permute.xlu1 %242  ;;  %818 = vmatmul.mubr.msk.f32.gmra.mrb[2].mxu1 %vm413_vm1, %v393_v25 }
  0xad   :  { %v333_v32 = vmul.f32 %v1049_v39, %v243_v30  ;;  %820 = vmatprep.mubr.msk.f32.mxu1 %vm896_vm0, %v897_v12 }
  0xae   :  { %v382_v35 = vmax.f32 %v357_v28, 0.0  ;;  %v215_v36 = vadd.f32 %v1044_v38, %v186_v29 }
  0xaf   :  { %v358_v37 = vadd.f32 %v333_v32, %v203_v31  ;;  %v69_v40 = vpop.permute.xlu0 %68  ;;  %v338_v31 = vmul.f32 %v1049_v39, %v1079_v6 }
  0xb0   :  { %v175_v42 = vmul.f32 %v1037_v34, %v69_v40  ;;  %v291_v43 = vpop.permute.xlu1 %290  ;;  %785 = vmatmul.mubr.msk.f32.gmra.mrb[6].mxu0 %vm413_vm1, %v382_v35  ;;  %821 = vmatmul.mubr.msk.f32.gmra.mrb[4].mxu1 %vm413_vm1, %v394_v33 }
  0xb1   :  { %v383_v44 = vmax.f32 %v358_v37, 0.0  ;;  %v345_v45 = vmul.f32 %v1049_v39, %v291_v43  ;;  %787 = vmatprep.mubr.msk.f32.mxu0 %vm896_vm0, %v897_v12  ;;  %823 = vmatprep.mubr.msk.f32.mxu1 %vm896_vm0, %v897_v12 }
  0xb2   :  { %v204_v46 = vadd.f32 %v1044_v38, %v175_v42 }
  0xb3   :  { %v370_v47 = vadd.f32 %v345_v45, %v215_v36  ;;  %v134_v53 = vpop.permute.xlu0 %133 }
  0xb4   :  { %v359_v48 = vadd.f32 %v334_v41, %v204_v46  ;;  %788 = vmatmul.mubr.msk.f32.gmra.mrb[8].mxu0 %vm413_vm1, %v383_v44  ;;  %v188_v0 = vmul.f32 %v1037_v34, %v134_v53 }
  0xb5   :  { %v395_v49 = vmax.f32 %v370_v47, 0.0  ;;  %v129_v50 = vpop.permute.xlu1 %128  ;;  %790 = vmatprep.mubr.msk.f32.mxu0 %vm896_vm0, %v897_v12 }
  0xb6   :  { %v384_v51 = vmax.f32 %v359_v48, 0.0  ;;  %v187_v52 = vmul.f32 %v1037_v34, %v129_v50  ;;  %v217_v7 = vadd.f32 %v1044_v38, %v188_v0 }
  0xb7   :  { %824 = vmatmul.mubr.msk.f32.gmra.mrb[6].mxu1 %vm413_vm1, %v395_v49  ;;  %v79_v58 = vpop.permute.xlu0 %78 }
  0xb8   :  { %826 = vmatprep.mubr.msk.f32.mxu1 %vm896_vm0, %v897_v12  ;;  %791 = vmatmul.mubr.msk.f32.gmra.mrb[10].mxu0 %vm413_vm1, %v384_v51  ;;  %v216_v55 = vadd.f32 %v1044_v38, %v187_v52  ;;  %v177_v59 = vmul.f32 %v1037_v34, %v79_v58  ;;  %v340_v58 = vmul.f32 %v1049_v39, %v1084_v8 }
  0xb9   :  { %793 = vmatprep.mubr.msk.f32.mxu0 %vm896_vm0, %v897_v12 }
  0xba   :  { %v295_v54 = vpop.permute.xlu1 %294  ;;  %v206_v1 = vadd.f32 %v1044_v38, %v177_v59 }
  0xbb   :  { %v346_v56 = vmul.f32 %v1049_v39, %v295_v54  ;;  %v144_v19 = vpop.permute.xlu0 %143 }
  0xbc   :  { %v361_v9 = vadd.f32 %v336_v63, %v206_v1  ;;  %v190_v29 = vmul.f32 %v1037_v34, %v144_v19 }
  0xbd   :  { %v371_v57 = vadd.f32 %v346_v56, %v216_v55 }
  0xbe   :  { %v386_v15 = vmax.f32 %v361_v9, 0.0  ;;  %v219_v36 = vadd.f32 %v1044_v38, %v190_v29 }
  0xbf   :  { %v396_v60 = vmax.f32 %v371_v57, 0.0  ;;  %v74_v61 = vpop.permute.xlu1 %73  ;;  %v89_v26 = vpop.permute.xlu0 %88 }
  0xc0   :  { %v176_v62 = vmul.f32 %v1037_v34, %v74_v61  ;;  %v179_v27 = vmul.f32 %v1037_v34, %v89_v26 }
  0xc1   :  { %827 = vmatmul.mubr.msk.f32.gmra.mrb[8].mxu1 %vm413_vm1, %v396_v60 }
  0xc2   :  { %829 = vmatprep.mubr.msk.f32.mxu1 %vm896_vm0, %v897_v12  ;;  %v205_v4 = vadd.f32 %v1044_v38, %v176_v62  ;;  %v208_v32 = vadd.f32 %v1044_v38, %v179_v27 }
  0xc3   :  { %v154_v48 = vpop.permute.xlu0 %153 }
  0xc4   :  { %v251_v3 = vpop.permute.xlu1 %250  ;;  %v363_v41 = vadd.f32 %v338_v31, %v208_v32  ;;  %v192_v60 = vmul.f32 %v1037_v34, %v154_v48 }
  0xc5   :  { %v335_v5 = vmul.f32 %v1049_v39, %v251_v3 }
  0xc6   :  { %v388_v6 = vmax.f32 %v363_v41, 0.0  ;;  %v221_v3 = vadd.f32 %v1044_v38, %v192_v60 }
  0xc7   :  { %v360_v10 = vadd.f32 %v335_v5, %v205_v4  ;;  %v99_v53 = vpop.permute.xlu0 %98 }
  0xc8   :  { %v299_v11 = vpop.permute.xlu1 %298  ;;  %v181_v56 = vmul.f32 %v1037_v34, %v99_v53 }
  0xc9   :  { %v385_v13 = vmax.f32 %v360_v10, 0.0  ;;  %v347_v14 = vmul.f32 %v1049_v39, %v299_v11 }
  0xca   :  { %v210_v61 = vadd.f32 %v1044_v38, %v181_v56 }
  0xcb   :  { %v372_v16 = vadd.f32 %v347_v14, %v217_v7  ;;  %794 = vmatmul.mubr.msk.f32.gmra.mrb[12].mxu0 %vm413_vm1, %v385_v13 }
  0xcc   :  { %796 = vmatprep.mubr.msk.f32.mxu0 %vm896_vm0, %v897_v12  ;;  %v365_v4 = vadd.f32 %v340_v58, %v210_v61 }
  0xcd   :  { %v397_v2 = vmax.f32 %v372_v16, 0.0  ;;  %v139_v17 = vpop.permute.xlu1 %138 }
  0xce   :  { %v189_v18 = vmul.f32 %v1037_v34, %v139_v17  ;;  %v390_v8 = vmax.f32 %v365_v4, 0.0 }
  0xcf   :  { %797 = vmatmul.mubr.msk.f32.gmra.mrb[14].mxu0 %vm413_vm1, %v386_v15  ;;  %830 = vmatmul.mubr.msk.f32.gmra.mrb[10].mxu1 %vm413_vm1, %v397_v2 }
  0xd0   :  { %832 = vmatprep.mubr.msk.f32.mxu1 %vm896_vm0, %v897_v12  ;;  %799 = vmatprep.mubr.msk.f32.mxu0 %vm896_vm0, %v897_v12  ;;  %v218_v21 = vadd.f32 %v1044_v38, %v189_v18 }
  0xd2   :  { %v303_v20 = vpop.permute.xlu1 %302 }
  0xd3   :  { %v348_v22 = vmul.f32 %v1049_v39, %v303_v20  ;;  %v164_v20 = vpop.permute.xlu0 %163 }
  0xd5   :  { %v373_v23 = vadd.f32 %v348_v22, %v218_v21  ;;  %v194_v22 = vmul.f32 %v1037_v34, %v164_v20 }
  0xd7   :  { %v398_v24 = vmax.f32 %v373_v23, 0.0  ;;  %v84_v25 = vpop.permute.xlu1 %83  ;;  %v223_v27 = vadd.f32 %v1044_v38, %v194_v22 }
  0xd8   :  { %v178_v28 = vmul.f32 %v1037_v34, %v84_v25 }
  0xd9   :  { %833 = vmatmul.mubr.msk.f32.gmra.mrb[12].mxu1 %vm413_vm1, %v398_v24 }
  0xda   :  { %835 = vmatprep.mubr.msk.f32.mxu1 %vm896_vm0, %v897_v12  ;;  %v207_v33 = vadd.f32 %v1044_v38, %v178_v28 }
  0xdc   :  { %v259_v30 = vpop.permute.xlu1 %258 }
  0xdd   :  { %v337_v35 = vmul.f32 %v1049_v39, %v259_v30 }
  0xdf   :  { %v362_v37 = vadd.f32 %v337_v35, %v207_v33 }
  0xe0   :  { %v307_v40 = vpop.permute.xlu1 %306 }
  0xe1   :  { %v387_v42 = vmax.f32 %v362_v37, 0.0  ;;  %v349_v43 = vmul.f32 %v1049_v39, %v307_v40 }
  0xe3   :  { %v374_v44 = vadd.f32 %v349_v43, %v219_v36  ;;  %800 = vmatmul.mubr.msk.f32.gmra.mrb[16].mxu0 %vm413_vm1, %v387_v42 }
  0xe4   :  { %802 = vmatprep.mubr.msk.f32.mxu0 %vm896_vm0, %v897_v12 }
  0xe5   :  { %v399_v45 = vmax.f32 %v374_v44, 0.0  ;;  %v149_v46 = vpop.permute.xlu1 %148 }
  0xe6   :  { %v191_v47 = vmul.f32 %v1037_v34, %v149_v46 }
  0xe7   :  { %803 = vmatmul.mubr.msk.f32.gmra.mrb[18].mxu0 %vm413_vm1, %v388_v6  ;;  %836 = vmatmul.mubr.msk.f32.gmra.mrb[14].mxu1 %vm413_vm1, %v399_v45 }
  0xe8   :  { %838 = vmatprep.mubr.msk.f32.mxu1 %vm896_vm0, %v897_v12  ;;  %805 = vmatprep.mubr.msk.f32.mxu0 %vm896_vm0, %v897_v12  ;;  %v220_v50 = vadd.f32 %v1044_v38, %v191_v47 }
  0xea   :  { %v311_v49 = vpop.permute.xlu1 %310 }
  0xeb   :  { %v350_v51 = vmul.f32 %v1049_v39, %v311_v49 }
  0xed   :  { %v375_v52 = vadd.f32 %v350_v51, %v220_v50 }
  0xef   :  { %v400_v54 = vmax.f32 %v375_v52, 0.0  ;;  %v94_v55 = vpop.permute.xlu1 %93 }
  0xf0   :  { %v180_v57 = vmul.f32 %v1037_v34, %v94_v55 }
  0xf1   :  { %839 = vmatmul.mubr.msk.f32.gmra.mrb[16].mxu1 %vm413_vm1, %v400_v54 }
  0xf2   :  { %841 = vmatprep.mubr.msk.f32.mxu1 %vm896_vm0, %v897_v12  ;;  %v209_v62 = vadd.f32 %v1044_v38, %v180_v57 }
  0xf4   :  { %v267_v59 = vpop.permute.xlu1 %266 }
  0xf5   :  { %v339_v63 = vmul.f32 %v1049_v39, %v267_v59 }
  0xf7   :  { %v364_v0 = vadd.f32 %v339_v63, %v209_v62 }
  0xf8   :  { %v315_v1 = vpop.permute.xlu1 %314 }
  0xf9   :  { %v389_v5 = vmax.f32 %v364_v0, 0.0  ;;  %v351_v7 = vmul.f32 %v1049_v39, %v315_v1 }
  0xfb   :  { %v376_v9 = vadd.f32 %v351_v7, %v221_v3  ;;  %806 = vmatmul.mubr.msk.f32.gmra.mrb[20].mxu0 %vm413_vm1, %v389_v5 }
  0xfc   :  { %808 = vmatprep.mubr.msk.f32.mxu0 %vm896_vm0, %v897_v12 }
  0xfd   :  { %v401_v10 = vmax.f32 %v376_v9, 0.0  ;;  %v159_v11 = vpop.permute.xlu1 %158 }
  0xfe   :  { %v193_v13 = vmul.f32 %v1037_v34, %v159_v11 }
  0xff   :  { %809 = vmatmul.mubr.msk.f32.gmra.mrb[22].mxu0 %vm413_vm1, %v390_v8  ;;  %842 = vmatmul.mubr.msk.f32.gmra.mrb[18].mxu1 %vm413_vm1, %v401_v10 }
 0x100   :  { %844 = vmatprep.mubr.msk.f32.mxu1 %vm896_vm0, %v897_v12  ;;  %811 = vmatprep.mubr.msk.f32.mxu0 %vm896_vm0, %v897_v12  ;;  %v222_v15 = vadd.f32 %v1044_v38, %v193_v13 }
 0x102   :  { %v319_v14 = vpop.permute.xlu1 %318 }
 0x103   :  { %v352_v16 = vmul.f32 %v1049_v39, %v319_v14 }
 0x105   :  { %v377_v2 = vadd.f32 %v352_v16, %v222_v15 }
 0x107   :  { %v402_v17 = vmax.f32 %v377_v2, 0.0  ;;  %v104_v18 = vpop.permute.xlu1 %103 }
 0x108   :  { %v182_v19 = vmul.f32 %v1037_v34, %v104_v18 }
 0x109   :  { %845 = vmatmul.mubr.msk.f32.gmra.mrb[20].mxu1 %vm413_vm1, %v402_v17 }
 0x10a   :  { %847 = vmatprep.mubr.msk.f32.mxu1 %vm896_vm0, %v897_v12  ;;  %v211_v23 = vadd.f32 %v1044_v38, %v182_v19  ;;  %v1214_v12 = vld [vmem:[%s1342_s2 + $0x20] ss:$0 sm:$0xff] }
 0x10c   :  { %v275_v21 = vpop.permute.xlu1 %274 }
 0x10d   :  { %v341_v24 = vmul.f32 %v1049_v39, %v275_v21 }
 0x10f   :  { %v366_v25 = vadd.f32 %v341_v24, %v211_v23 }
 0x110   :  { %v323_v26 = vpop.permute.xlu1 %322 }
 0x111   :  { %v391_v28 = vmax.f32 %v366_v25, 0.0  ;;  %v353_v29 = vmul.f32 %v1049_v39, %v323_v26 }
 0x113   :  { %v378_v30 = vadd.f32 %v353_v29, %v223_v27  ;;  %812 = vmatmul.mubr.msk.f32.gmra.mrb[24].mxu0 %vm413_vm1, %v391_v28 }
 0x115   :  { %v403_v31 = vmax.f32 %v378_v30, 0.0 }
 0x117   :  { %848 = vmatmul.mubr.msk.f32.gmra.mrb[22].mxu1 %vm413_vm1, %v403_v31 }
 0x160   :  { %v555_v34 = vpop.f32.mrb[0].mxu0 }
 0x161   :  { %v556_v32 = vadd.f32 %v1214_v12, %v555_v34  ;;  %v777_v33 = vpop.f32.mrb[1].mxu0 }
 0x163   :  { %680 = vst.msk [vmem:[%s1344_s3] sm:$0xff] %vm679_vm2, %v556_v32 }
 0x164   :  { %v560_v38 = vpop.f32.mrb[2].mxu0 }
 0x165   :  { %v561_v39 = vadd.f32 %v1214_v12, %v560_v38  ;;  %v620_v35 = vpop.f32.mrb[0].mxu1  ;;  %v780_v36 = vpop.f32.mrb[3].mxu0 }
 0x166   :  { %v621_v37 = vadd.f32 %v1214_v12, %v620_v35  ;;  %v816_v40 = vpop.f32.mrb[1].mxu1 }
 0x167   :  { %681 = vst.msk [vmem:[%s1344_s3 + $0x8] sm:$0xff] %vm679_vm2, %v561_v39 }
 0x168   :  { %693 = vst.msk [vmem:[%s1344_s3 + $0x68] sm:$0xff] %vm679_vm2, %v621_v37 }
 0x16e   :  { %v565_v41 = vpop.f32.mrb[4].mxu0 }
 0x16f   :  { %v566_v42 = vadd.f32 %v1214_v12, %v565_v41  ;;  %v783_v43 = vpop.f32.mrb[5].mxu0 }
 0x171   :  { %682 = vst.msk [vmem:[%s1344_s3 + $0x10] sm:$0xff] %vm679_vm2, %v566_v42 }
 0x17f   :  { %v625_v44 = vpop.f32.mrb[2].mxu1 }
 0x180   :  { %v626_v6 = vadd.f32 %v1214_v12, %v625_v44  ;;  %v819_v45 = vpop.f32.mrb[3].mxu1 }
 0x182   :  { %694 = vst.msk [vmem:[%s1344_s3 + $0x70] sm:$0xff] %vm679_vm2, %v626_v6 }
 0x183   :  { %v630_v46 = vpop.f32.mrb[4].mxu1  ;;  %v570_v47 = vpop.f32.mrb[6].mxu0 }
 0x184   :  { %v631_v48 = vadd.f32 %v1214_v12, %v630_v46  ;;  %v822_v49 = vpop.f32.mrb[5].mxu1  ;;  %v571_v50 = vadd.f32 %v1214_v12, %v570_v47  ;;  %v786_v51 = vpop.f32.mrb[7].mxu0 }
 0x186   :  { %695 = vst.msk [vmem:[%s1344_s3 + $0x78] sm:$0xff] %vm679_vm2, %v631_v48  ;;  %683 = vst.msk [vmem:[%s1344_s3 + $0x18] sm:$0xff] %vm679_vm2, %v571_v50 }
 0x187   :  { %v575_v52 = vpop.f32.mrb[8].mxu0 }
 0x188   :  { %v576_v53 = vadd.f32 %v1214_v12, %v575_v52  ;;  %v789_v54 = vpop.f32.mrb[9].mxu0 }
 0x18a   :  { %684 = vst.msk [vmem:[%s1344_s3 + $0x20] sm:$0xff] %vm679_vm2, %v576_v53  ;;  %v635_v55 = vpop.f32.mrb[6].mxu1 }
 0x18b   :  { %v636_v56 = vadd.f32 %v1214_v12, %v635_v55  ;;  %v825_v57 = vpop.f32.mrb[7].mxu1  ;;  %v580_v58 = vpop.f32.mrb[10].mxu0 }
 0x18c   :  { %v581_v59 = vadd.f32 %v1214_v12, %v580_v58  ;;  %v792_v60 = vpop.f32.mrb[11].mxu0 }
 0x18d   :  { %696 = vst.msk [vmem:[%s1344_s3 + $0x80] sm:$0xff] %vm679_vm2, %v636_v56 }
 0x18e   :  { %685 = vst.msk [vmem:[%s1344_s3 + $0x28] sm:$0xff] %vm679_vm2, %v581_v59 }
 0x194   :  { %v640_v61 = vpop.f32.mrb[8].mxu1 }
 0x195   :  { %v641_v62 = vadd.f32 %v1214_v12, %v640_v61  ;;  %v828_v63 = vpop.f32.mrb[9].mxu1 }
 0x197   :  { %697 = vst.msk [vmem:[%s1344_s3 + $0x88] sm:$0xff] %vm679_vm2, %v641_v62 }
 0x19e   :  { %v585_v0 = vpop.f32.mrb[12].mxu0 }
 0x19f   :  { %v586_v1 = vadd.f32 %v1214_v12, %v585_v0  ;;  %v795_v3 = vpop.f32.mrb[13].mxu0 }
 0x1a1   :  { %686 = vst.msk [vmem:[%s1344_s3 + $0x30] sm:$0xff] %vm679_vm2, %v586_v1 }
 0x1a2   :  { %v590_v4 = vpop.f32.mrb[14].mxu0  ;;  %v645_v5 = vpop.f32.mrb[10].mxu1 }
 0x1a3   :  { %v591_v7 = vadd.f32 %v1214_v12, %v590_v4  ;;  %v646_v9 = vadd.f32 %v1214_v12, %v645_v5  ;;  %v798_v8 = vpop.f32.mrb[15].mxu0  ;;  %v831_v10 = vpop.f32.mrb[11].mxu1 }
 0x1a5   :  { %687 = vst.msk [vmem:[%s1344_s3 + $0x38] sm:$0xff] %vm679_vm2, %v591_v7  ;;  %698 = vst.msk [vmem:[%s1344_s3 + $0x90] sm:$0xff] %vm679_vm2, %v646_v9 }
 0x1ac   :  { %v650_v11 = vpop.f32.mrb[12].mxu1 }
 0x1ad   :  { %v651_v13 = vadd.f32 %v1214_v12, %v650_v11  ;;  %v834_v14 = vpop.f32.mrb[13].mxu1 }
 0x1af   :  { %699 = vst.msk [vmem:[%s1344_s3 + $0x98] sm:$0xff] %vm679_vm2, %v651_v13 }
 0x1b6   :  { %v595_v15 = vpop.f32.mrb[16].mxu0 }
 0x1b7   :  { %v596_v16 = vadd.f32 %v1214_v12, %v595_v15  ;;  %v801_v2 = vpop.f32.mrb[17].mxu0 }
 0x1b9   :  { %688 = vst.msk [vmem:[%s1344_s3 + $0x40] sm:$0xff] %vm679_vm2, %v596_v16 }
 0x1ba   :  { %v600_v17 = vpop.f32.mrb[18].mxu0  ;;  %v655_v18 = vpop.f32.mrb[14].mxu1 }
 0x1bb   :  { %v601_v19 = vadd.f32 %v1214_v12, %v600_v17  ;;  %v656_v20 = vadd.f32 %v1214_v12, %v655_v18  ;;  %v804_v21 = vpop.f32.mrb[19].mxu0  ;;  %v837_v22 = vpop.f32.mrb[15].mxu1 }
 0x1bd   :  { %689 = vst.msk [vmem:[%s1344_s3 + $0x48] sm:$0xff] %vm679_vm2, %v601_v19  ;;  %700 = vst.msk [vmem:[%s1344_s3 + $0xa0] sm:$0xff] %vm679_vm2, %v656_v20 }
 0x1c4   :  { %v660_v23 = vpop.f32.mrb[16].mxu1 }
 0x1c5   :  { %v661_v24 = vadd.f32 %v1214_v12, %v660_v23  ;;  %v840_v25 = vpop.f32.mrb[17].mxu1 }
 0x1c7   :  { %701 = vst.msk [vmem:[%s1344_s3 + $0xa8] sm:$0xff] %vm679_vm2, %v661_v24 }
 0x1ce   :  { %v605_v26 = vpop.f32.mrb[20].mxu0 }
 0x1cf   :  { %v606_v27 = vadd.f32 %v1214_v12, %v605_v26  ;;  %v807_v28 = vpop.f32.mrb[21].mxu0 }
 0x1d1   :  { %690 = vst.msk [vmem:[%s1344_s3 + $0x50] sm:$0xff] %vm679_vm2, %v606_v27 }
 0x1d2   :  { %v610_v29 = vpop.f32.mrb[22].mxu0  ;;  %v665_v30 = vpop.f32.mrb[18].mxu1 }
 0x1d3   :  { %v611_v31 = vadd.f32 %v1214_v12, %v610_v29  ;;  %v666_v34 = vadd.f32 %v1214_v12, %v665_v30  ;;  %v810_v32 = vpop.f32.mrb[23].mxu0  ;;  %v843_v33 = vpop.f32.mrb[19].mxu1 }
 0x1d5   :  { %691 = vst.msk [vmem:[%s1344_s3 + $0x58] sm:$0xff] %vm679_vm2, %v611_v31  ;;  %702 = vst.msk [vmem:[%s1344_s3 + $0xb0] sm:$0xff] %vm679_vm2, %v666_v34 }
 0x1dc   :  { %v670_v38 = vpop.f32.mrb[20].mxu1 }
 0x1dd   :  { %v671_v39 = vadd.f32 %v1214_v12, %v670_v38  ;;  %v846_v35 = vpop.f32.mrb[21].mxu1 }
 0x1df   :  { %703 = vst.msk [vmem:[%s1344_s3 + $0xb8] sm:$0xff] %vm679_vm2, %v671_v39 }
 0x1e6   :  { %v615_v36 = vpop.f32.mrb[24].mxu0 }
 0x1e7   :  { %v616_v37 = vadd.f32 %v1214_v12, %v615_v36  ;;  %v813_v40 = vpop.f32.mrb[25].mxu0 }
 0x1e9   :  { %692 = vst.msk [vmem:[%s1344_s3 + $0x60] sm:$0xff] %vm679_vm2, %v616_v37 }
 0x1ea   :  { %v675_v41 = vpop.f32.mrb[22].mxu1 }
 0x1eb   :  { %v676_v42 = vadd.f32 %v1214_v12, %v675_v41  ;;  %v849_v43 = vpop.f32.mrb[23].mxu1 }
 0x1ed   :  { %704 = vst.msk [vmem:[%s1344_s3 + $0xc0] sm:$0xff] %vm679_vm2, %v676_v42 }

</bundles_post_ra>
